<compile_context>
chip_gen: v7x
topology: tpu7x:2x2x1
jax: 0.10.0
libtpu: 0.0.40
codegen_flags: <defaults>
</compile_context>

<pallas_src>
import functools

import jax
import jax.numpy as jnp
from jax.experimental import pallas as pl
from jax.experimental.pallas import tpu as pltpu


def _round_up(x, m):
    return ((x + m - 1) // m) * m


def _choose_tn(V, tn_max):
    """Pick a vocab tile size, preferring no padding and lane-dense (128k) tiles."""
    if V <= tn_max:
        # Single tile covering the full vocab dim (block == full dim is always legal).
        return V, V
    # Try a 128-multiple tile that divides V exactly (vocabs are usually 128-multiples).
    t = (tn_max // 128) * 128
    while t >= 128:
        if V % t == 0:
            return t, V
        t -= 128
    # Fallback: pad V up to a multiple of a 128-aligned tile.
    tn_eff = max(128, (tn_max // 128) * 128)
    return tn_eff, _round_up(V, tn_eff)


def _generator_kernel(x_ref, w_ref, b_ref, o_ref):
    # x_ref: (tm, D)  w_ref: (D, tn)  b_ref: (1, tn)  o_ref: (tm, tn)
    acc = jnp.dot(x_ref[...], w_ref[...], preferred_element_type=jnp.float32)
    o_ref[...] = (acc + b_ref[...].astype(jnp.float32)).astype(o_ref.dtype)


@functools.partial(
    jax.jit,
    static_argnames=("tm", "tn", "compute_dtype", "out_dtype", "vmem_limit_bytes"),
)
def generator_forward(
    x,
    weight,
    bias,
    *,
    tm: int = 512,
    tn: int = 512,
    compute_dtype=None,
    out_dtype=None,
    vmem_limit_bytes=None,
):
    """Linear projection: x [B, S, D] -> logits [B, S, V].

    weight: [D, V] (already transposed from torch's [V, D]); bias: [V].

    compute_dtype=jnp.bfloat16 enables the bf16 MXU path (f32 accumulation kept);
    for best results pass W already stored in bf16 upstream so the cast is not
    re-done every call.  out_dtype=jnp.bfloat16 halves the logits writeback.
    """
    B, S, D = x.shape
    V = weight.shape[1]
    M = B * S
    if out_dtype is None:
        out_dtype = x.dtype

    # --- tile sizes -------------------------------------------------------
    tm_eff = min(tm, _round_up(M, 8))
    tm_eff = max(8, (tm_eff // 8) * 8)
    Mp = _round_up(M, tm_eff)
    tn_eff, Vp = _choose_tn(V, tn)

    x2d = x.reshape(M, D)
    w2d = weight
    b1d = bias

    if compute_dtype is not None:
        x2d = x2d.astype(compute_dtype)
        w2d = w2d.astype(compute_dtype)

    # Row padding only (cheap: pads x, never the D x V weight when tn divides V).
    if Mp != M:
        x2d = jnp.pad(x2d, ((0, Mp - M), (0, 0)))
    if Vp != V:  # only hit for vocabs that are not 128-multiples and exceed tn
        w2d = jnp.pad(w2d, ((0, 0), (0, Vp - V)))
        b1d = jnp.pad(b1d, ((0, Vp - V),))
    b2d = b1d.reshape(1, Vp)

    nv = Vp // tn_eff  # outer (vocab) grid axis -> megacore split lands on V
    nm = Mp // tm_eff  # inner (row)  grid axis -> W/bias tiles stay VMEM-resident
    grid = (nv, nm)

    # --- VMEM budget ------------------------------------------------------
    in_isz = x2d.dtype.itemsize
    out_isz = jnp.dtype(out_dtype).itemsize
    tile_bytes = 2 * (
        tm_eff * D * in_isz       # x tile (double-buffered)
        + D * tn_eff * in_isz     # W tile
        + tn_eff * in_isz         # bias tile
        + tm_eff * tn_eff * out_isz  # out tile
    )
    if vmem_limit_bytes is None:
        vmem_limit_bytes = int(min(max(tile_bytes + (16 << 20), 32 << 20), 100 << 20))

    # --- cost model (actual traffic after the axis swap) -------------------
    cost = pl.CostEstimate(
        flops=2 * Mp * D * Vp,
        transcendentals=0,
        bytes_accessed=(
            D * Vp * w2d.dtype.itemsize      # W read exactly once
            + Mp * D * in_isz * nv           # x re-streamed once per vocab tile
            + Vp * b2d.dtype.itemsize        # bias once
            + Mp * Vp * out_isz              # logits written once
        ),
    )

    out2d = pl.pallas_call(
        _generator_kernel,
        out_shape=jax.ShapeDtypeStruct((Mp, Vp), out_dtype),
        grid_spec=pltpu.PrefetchScalarGridSpec(
            num_scalar_prefetch=0,
            grid=grid,
            in_specs=[
                # x: depends only on the inner (row) axis
                pl.BlockSpec((tm_eff, D), lambda j, i: (i, 0)),
                # W: depends only on the outer (vocab) axis -> resident across inner sweep
                pl.BlockSpec((D, tn_eff), lambda j, i: (0, j)),
                # bias: likewise resident
                pl.BlockSpec((1, tn_eff), lambda j, i: (0, j)),
            ],
            out_specs=pl.BlockSpec((tm_eff, tn_eff), lambda j, i: (i, j)),
        ),
        compiler_params=pltpu.CompilerParams(
            dimension_semantics=("parallel", "parallel"),
            vmem_limit_bytes=vmem_limit_bytes,
        ),
        cost_estimate=cost,
    )(x2d, w2d, b2d)

    if Mp != M or Vp != V:
        out2d = out2d[:M, :V]
    return out2d.reshape(B, S, V)


if __name__ == "__main__":
    # Small shapes consistent with the module: batch=2, seq=8, d_model=32, vocab=64
    B, S, D, V = 2, 8, 32, 64

    key = jax.random.PRNGKey(0)
    kx, kw, kb = jax.random.split(key, 3)

    x = jax.random.normal(kx, (B, S, D), dtype=jnp.float32)
    # Deterministic synthetic parameters (mimicking nn.Linear(d_model, vocab) shapes)
    weight = jax.random.normal(kw, (D, V), dtype=jnp.float32) * (1.0 / jnp.sqrt(D))
    bias = jax.random.normal(kb, (V,), dtype=jnp.float32) * 0.01

    out = generator_forward(x, weight, bias)
    out = jax.block_until_ready(out)

    # Sanity check against plain-JAX reference
    ref = x @ weight + bias
    assert out.shape == (B, S, V)
    assert jnp.allclose(out, ref, atol=1e-5, rtol=1e-5)

    print("KERNEL_OK")
</pallas_src>

<mosaic_0001>
module attributes {stable_mosaic.version = 11 : i64} {
  func.func @_generator_kernel(%arg0: i32, %arg1: i32, %arg2: memref<16x32xf32, #tpu.memory_space<vmem>>, %arg3: memref<32x64xf32, #tpu.memory_space<vmem>>, %arg4: memref<1x64xf32, #tpu.memory_space<vmem>>, %arg5: memref<16x64xf32, #tpu.memory_space<vmem>>) attributes {dimension_semantics = [#tpu.dimension_semantics<parallel>, #tpu.dimension_semantics<parallel>], iteration_bounds = array<i64: 1, 1>, scalar_prefetch = 0 : i64, scratch_operands = 0 : i64, tpu.core_type = #tpu.core_type<tc>, window_params = [{transform_indices = @transform_0, window_bounds = array<i64: 16, 32>}, {transform_indices = @transform_1, window_bounds = array<i64: 32, 64>}, {transform_indices = @transform_2, window_bounds = array<i64: 1, 64>}, {transform_indices = @transform_3, window_bounds = array<i64: 16, 64>}]} {
    %c0 = arith.constant 0 : index
    %c0_0 = arith.constant 0 : index
    %0 = vector.load %arg2[%c0, %c0_0] : memref<16x32xf32, #tpu.memory_space<vmem>>, vector<16x32xf32>
    %c0_1 = arith.constant 0 : index
    %c0_2 = arith.constant 0 : index
    %1 = vector.load %arg3[%c0_1, %c0_2] : memref<32x64xf32, #tpu.memory_space<vmem>>, vector<32x64xf32>
    %cst = arith.constant dense<0.000000e+00> : vector<16x64xf32>
    %2 = tpu.matmul %0, %1, %cst {dimension_numbers = #tpu.dot_dimension_numbers<[1], [0], [0], [1], [0, 0, 1, 1], [], []>} : vector<16x32xf32>, vector<32x64xf32>, vector<16x64xf32> -> vector<16x64xf32>
    %c0_3 = arith.constant 0 : index
    %c0_4 = arith.constant 0 : index
    %3 = vector.load %arg4[%c0_3, %c0_4] : memref<1x64xf32, #tpu.memory_space<vmem>>, vector<1x64xf32>
    %4 = vector.broadcast %3 : vector<1x64xf32> to vector<16x64xf32>
    %5 = arith.addf %2, %4 : vector<16x64xf32>
    %c0_5 = arith.constant 0 : index
    %c0_6 = arith.constant 0 : index
    %6 = vector.load %arg5[%c0_5, %c0_6] : memref<16x64xf32, #tpu.memory_space<vmem>>, vector<16x64xf32>
    tpu.vector_store %arg5[%c0_5, %c0_6], %5 {strides = array<i32>} : memref<16x64xf32, #tpu.memory_space<vmem>>, vector<16x64xf32>,
    return
  }
  func.func @transform_0(%arg0: i32, %arg1: i32) -> (i32, i32) {
    %c0_i32 = arith.constant 0 : i32
    %c0_i32_0 = arith.constant 0 : i32
    return %arg1, %c0_i32 : i32, i32
  }
  func.func @transform_1(%arg0: i32, %arg1: i32) -> (i32, i32) {
    %c0_i32 = arith.constant 0 : i32
    %c0_i32_0 = arith.constant 0 : i32
    return %c0_i32, %arg0 : i32, i32
  }
  func.func @transform_2(%arg0: i32, %arg1: i32) -> (i32, i32) {
    %c0_i32 = arith.constant 0 : i32
    %c0_i32_0 = arith.constant 0 : i32
    return %c0_i32, %arg0 : i32, i32
  }
  func.func @transform_3(%arg0: i32, %arg1: i32) -> (i32, i32) {
    %c0_i32 = arith.constant 0 : i32
    return %arg1, %arg0 : i32, i32
  }
}

</mosaic_0001>

<bundles_post_ra>
// kernel: generator_forward.1
= control target key start
LH: loop header
LB: loop body
LE: loop exit
PB: predicated region body
PF: predicated region fallthrough
CT: control target
= control target key end

     0   :  { %8 = vsyncpa [#allocation3], 0  ;;  %s337_s0 = inlined_call_operand.hbm [shape: f32[16,32], index: 0, kind: input, shape index: {}]   ;;  %s338_s1 = inlined_call_operand.hbm [shape: f32[32,64], index: 1, kind: input, shape index: {}]   ;;  %s339_s2 = inlined_call_operand.vmem [shape: f32[1,64], index: 2, kind: input, shape index: {}]   ;;  %s340_s3 = inlined_call_operand.hbm [shape: f32[16,64], index: 3, kind: output, shape index: {}]  }
   0x1   :  { %9 = vsyncpa [#allocation6], 0 }
   0x2   :  { %10 = vsyncpa [#allocation4], 0  ;;  %s264_s12 = smov [#allocation2]   ;;  %s192_s16 = scalar_lea.hbm %s337_s0, 256 }
   0x3   :  { %s16_s13 = sshll.u32 %s264_s12, 4  ;;  %p193_p0 = scmp.ne.s32.totalorder %s337_s0, %s192_s16  ;;  %s17_s13 = int_to_ptr.vmem [resolvable:$true] %s16_s13 }
   0x4   :  { %p196_p1 = scmp.lt.u32.totalorder %s192_s16, %s337_s0 }
   0x6   :  { %p198_p2 = pnand %p196_p1, %p193_p0 }
   0x8   :  { %201 = shalt.err (!%p198_p2)
}
   0x9   :  { %s202_s21 = scalar_lea.vmem %s17_s13, 256  ;;  %p207_p4 = scmp.lt.s32.totalorder %s17_s13, %s17_s13 }
   0xa   :  { %p203_p3 = scmp.ne.s32.totalorder %s17_s13, %s202_s21  ;;  %p208_p5 = scmp.lt.s32.totalorder %s202_s21, %s202_s21 }
   0xc   :  { %p209_p6 = por %p208_p5, %p207_p4 }
   0xe   :  { %p210_p7 = pnand %p209_p6, %p203_p3 }
  0x10   :  { %213 = shalt.err (!%p210_p7)
}
  0x11   :  { %s265_s22 = smov 128   ;;  %s266_s23 = smov 8  }
  0x12   :  { %22 = dma.hbm_to_vmem [thread:$0]  %s337_s0, 256, %s17_s13, [#allocation3], %s265_s22, %s265_s22, %s266_s23  }
  0x13   :  { %s267_s26 = smov [#allocation5]   ;;  %s214_s30 = scalar_lea.hbm %s338_s1, 512 }
  0x14   :  { %s28_s27 = sshll.u32 %s267_s26, 4  ;;  %p215_p8 = scmp.ne.s32.totalorder %s338_s1, %s214_s30  ;;  %s29_s27 = int_to_ptr.vmem [resolvable:$true] %s28_s27 }
  0x15   :  { %p218_p9 = scmp.lt.u32.totalorder %s214_s30, %s338_s1 }
  0x17   :  { %p220_p10 = pnand %p218_p9, %p215_p8 }
  0x19   :  { %223 = shalt.err (!%p220_p10)
}
  0x1a   :  { %s224_s8 = scalar_lea.vmem %s29_s27, 512  ;;  %p229_p12 = scmp.lt.s32.totalorder %s29_s27, %s29_s27 }
  0x1b   :  { %p225_p11 = scmp.ne.s32.totalorder %s29_s27, %s224_s8  ;;  %p230_p13 = scmp.lt.s32.totalorder %s224_s8, %s224_s8 }
  0x1d   :  { %p231_p0 = por %p230_p13, %p229_p12 }
  0x1f   :  { %p232_p1 = pnand %p231_p0, %p225_p11 }
  0x21   :  { %235 = shalt.err (!%p232_p1)
}
  0x22   :  { %34 = dma.hbm_to_vmem [thread:$0]  %s338_s1, 512, %s29_s27, [#allocation6], %s265_s22, %s265_s22, %s266_s23  }
  0x23   :  { %258 = dma.done.wait [#allocation3], 256  }
  0x24   :  { %259 = vsyncadd [#allocation3], 4294967040 }
  0x25   :  { %260 = dma.done.wait [#allocation6], 512  }
  0x26   :  { %261 = vsyncadd [#allocation6], 4294966784  ;;  %vm56_vm0 = vcmask 261120   ;;  %v45_v0 = vld [vmem:[#allocation5] sm:$0xff]  ;;  %v46_v1 = vld [vmem:[#allocation5 + $0x8] sm:$0xff]  ;;  %s268_s11 = smov [#allocation7]  }
  0x27   :  { %v47_v2 = vld [vmem:[#allocation5 + $0x10] sm:$0xff]  ;;  %v179_v3 = vpack.c.bf16 %v46_v1, %v45_v0  ;;  %v48_v4 = vld [vmem:[#allocation5 + $0x18] sm:$0xff]  ;;  %s146_s12 = sshll.u32 %s268_s11, 4  ;;  %vm138_vm1 = vcmask 523264   ;;  %s147_s12 = int_to_ptr.vmem [resolvable:$true] %s146_s12 }
  0x28   :  { %v43_v5 = vld [vmem:[#allocation2] sm:$0xff]  ;;  %v183_v6 = vpack.c.bf16 %v48_v4, %v47_v2  ;;  %v44_v7 = vld [vmem:[#allocation2 + $0x8] sm:$0xff]  ;;  %s236_s13 = scalar_lea.vmem %s147_s12, 256  ;;  %p241_p3 = scmp.lt.s32.totalorder %s147_s12, %s147_s12 }
  0x29   :  { %176 = vmatprep.mubr.msk.f32.mxu0 %vm56_vm0, %v43_v5  ;;  %180 = vmatprep.subr.bf16.mxu0 %v179_v3  ;;  %v159_v8 = vld [vmem:[%s339_s2] ss:$0 sm:$0xff]  ;;  %p237_p2 = scmp.ne.s32.totalorder %s147_s12, %s236_s13  ;;  %p242_p4 = scmp.lt.s32.totalorder %s236_s13, %s236_s13 }
  0x2a   :  { %182 = vmatpush3.bf16.msra.mxu0 %v179_v3 }
  0x2b   :  { %184 = vmatprep.subr.bf16.mxu0 %v183_v6  ;;  %p243_p5 = por %p242_p4, %p241_p3 }
  0x2d   :  { %p244_p6 = pnand %p243_p5, %p237_p2 }
  0x2e   :  { %186 = vmatpush3.bf16.msra.mxu0 %v183_v6 }
  0x31   :  { %177 = vmatmul.mubr.msk.f32.vlgmr.msra.gmra.mrb[0].mxu0 %vm56_vm0, %v44_v7 }
 0x104   :  { %v178_v9 = vpop.f32.mrb[0].mxu0 }
 0x105   :  { %v135_v10 = vadd.f32 %v178_v9, %v159_v8  ;;  %v129_v11 = vpop.f32.mrb[1].mxu0 }
 0x106   :  { %v130_v12 = vadd.f32 %v159_v8, %v129_v11 }
 0x107   :  { %140 = vst.msk [vmem:[#allocation7 + $0x8] sm:$0xff] %vm138_vm1, %v135_v10 }
 0x108   :  { %139 = vst.msk [vmem:[#allocation7] sm:$0xff] %vm138_vm1, %v130_v12 }
 0x109   :  { %247 = shalt.err (!%p244_p6)
}
 0x10a   :  { %s248_s2 = scalar_lea.hbm %s340_s3, 256 }
 0x10b   :  { %p249_p7 = scmp.ne.s32.totalorder %s340_s3, %s248_s2  ;;  %p252_p8 = scmp.lt.u32.totalorder %s248_s2, %s340_s3 }
 0x10d   :  { %p254_p9 = pnand %p252_p8, %p249_p7 }
 0x10f   :  { %257 = shalt.err (!%p254_p9)
}
 0x110   :  { %152 = dma.vmem_to_hbm [thread:$0]  %s147_s12, 256, %s340_s3, [#allocation4], %s265_s22, %s265_s22, %s266_s23  }
 0x111   :  { %262 = dma.done.wait [#allocation4], 256  }
 0x112   :  { %263 = vsyncadd [#allocation4], 4294967040 }
 0x113   :  { %156 = vsyncpa [#allocation3], 1 }
 0x114   :  { %157 = vsyncpa [#allocation6], 1 }
 0x115   :  { %158 = vsyncpa [#allocation4], 1 }

</bundles_post_ra>
